<compile_context>
chip_gen: v5e
topology: v5e:2x2
jax: 0.10.0
libtpu: 0.0.40
codegen_flags: <defaults>
</compile_context>

<pallas_src>
import functools

import jax
import jax.numpy as jnp
from jax.experimental import pallas as pl
from jax.experimental.pallas import tpu as pltpu

LANE = 128      # corners per lane-row
TR_MAX = 512    # sublane-rows per block -> 512*128 corners / block


def _corners_loss_kernel(x_ref, o_ref, *, use_filter):
    # x_ref: (7, TR, 128), o_ref: (3, TR, 128). Leading-axis indexing is free.
    cpx = x_ref[0]
    cpy = x_ref[1]
    l0 = x_ref[2]
    l1 = x_ref[3]
    gtx = x_ref[4]
    gty = x_ref[5]
    w = x_ref[6]

    # 2-class CrossEntropyLoss(reduction='none') with target = (w > 0).
    # (ignore_index=-1 can never trigger: targets are always 0/1.)
    # logsumexp(l0, l1) = max(l0, l1) + log(1 + exp(-|l0 - l1|))  -> one exp + one log.
    d = jnp.abs(l0 - l1)
    lse = jnp.maximum(l0, l1) + jnp.log(1.0 + jnp.exp(-d))
    picked = jnp.where(w > 0, l1, l0)
    o_ref[0] = lse - picked

    # MSELoss(reduction='none'), optionally scaled by the gt visibility weight.
    dx = cpx - gtx
    dy = cpy - gty
    rx = dx * dx
    ry = dy * dy
    if use_filter:
        rx = rx * w
        ry = ry * w
    o_ref[1] = rx
    o_ref[2] = ry


def corners_loss(preds, targets, *, split_loss=False, use_filter=True):
    """preds: (N, M, 32), targets: (N, M, 24)  ->  (N, M, 24) float32."""
    del split_loss  # stored but unused by the PyTorch forward as well
    N, M = preds.shape[:2]
    K = N * M * 8   # total corners

    # --- layout glue (plain JAX; reshapes are free, the transpose is one fused XLA copy).
    # TODO(synk): fold the stride-4 / stride-3 de-interleave into the kernel via in-kernel
    # lane shuffles to remove this extra HBM pass entirely.
    enc = preds.reshape(K, 4).astype(jnp.float32)    # [cpx, cpy, logit0, logit1]
    tgt = targets.reshape(K, 3).astype(jnp.float32)  # [gtx, gty, w]
    feats = jnp.concatenate([enc, tgt], axis=1).T    # (7, K)

    # Corners -> (rows, 128-lane) plane; features stay on the leading axis.
    R = pl.cdiv(K, LANE)
    if R <= TR_MAX:
        TR = R          # single block; block dim == full array dim is always legal
    else:
        TR = TR_MAX     # multiple of 8; grid >= 2 steps (v7x megacore-friendly)
    R_pad = pl.cdiv(R, TR) * TR
    K_pad = R_pad * LANE
    if K_pad != K:
        feats = jnp.pad(feats, ((0, 0), (0, K_pad - K)))
    feats = feats.reshape(7, R_pad, LANE)

    out = pl.pallas_call(
        functools.partial(_corners_loss_kernel, use_filter=use_filter),
        out_shape=jax.ShapeDtypeStruct((3, R_pad, LANE), jnp.float32),
        grid_spec=pl.GridSpec(
            grid=(R_pad // TR,),
            in_specs=[pl.BlockSpec((7, TR, LANE), lambda i: (0, i, 0))],
            out_specs=pl.BlockSpec((3, TR, LANE), lambda i: (0, i, 0)),
        ),
        compiler_params=pltpu.CompilerParams(
            dimension_semantics=("parallel",)),
    )(feats)

    total = out.reshape(3, K_pad)[:, :K].T   # (K, 3) = [cls_loss, reg_x, reg_y]
    return total.reshape(N, M, 8 * 3)        # (N, M, 24)


def _reference(preds, targets, use_filter=True):
    """Pure-JAX reference mirroring the PyTorch forward, for verification."""
    N, M = preds.shape[:2]
    enc = preds.reshape(N, M, 8, 4).astype(jnp.float32)
    tgt = targets.reshape(N, M, 8, 3).astype(jnp.float32)
    corners_preds = enc[..., :2].reshape(-1, 2)
    cls_preds = enc[..., 2:].reshape(-1, 2)
    corners_gt = tgt[..., :2].reshape(-1, 2)
    w = tgt[..., 2].reshape(-1, 1)
    cls_gt = (w[:, 0] > 0).astype(jnp.int32)
    lse = jax.scipy.special.logsumexp(cls_preds, axis=-1)
    picked = jnp.take_along_axis(cls_preds, cls_gt[:, None], axis=-1)[:, 0]
    cls_loss = lse - picked
    reg = (corners_preds - corners_gt) ** 2
    if use_filter:
        reg = reg * w
    total = jnp.concatenate([cls_loss[:, None], reg], axis=-1)
    return total.reshape(N, M, -1)


if __name__ == "__main__":
    key = jax.random.PRNGKey(0)

    # Case 1: K exactly one lane-row (no padding), use_filter=True.
    k1, k2, key = jax.random.split(key, 3)
    N, M = 2, 8
    preds = jax.random.normal(k1, (N, M, 32), dtype=jnp.float32)
    targets = jax.random.normal(k2, (N, M, 24), dtype=jnp.float32)  # mixed-sign weights
    out = jax.block_until_ready(corners_loss(preds, targets, use_filter=True))
    ref = _reference(preds, targets, use_filter=True)
    assert out.shape == (N, M, 24)
    assert jnp.allclose(out, ref, atol=1e-5, rtol=1e-5)

    # Case 2: K not a multiple of 128 (exercises the padded tail), use_filter=False.
    k3, k4, key = jax.random.split(key, 3)
    N2, M2 = 3, 7
    preds2 = jax.random.normal(k3, (N2, M2, 32), dtype=jnp.float32)
    targets2 = jax.random.normal(k4, (N2, M2, 24), dtype=jnp.float32)
    out2 = jax.block_until_ready(corners_loss(preds2, targets2, use_filter=False))
    ref2 = _reference(preds2, targets2, use_filter=False)
    assert out2.shape == (N2, M2, 24)
    assert jnp.allclose(out2, ref2, atol=1e-5, rtol=1e-5)

    print("KERNEL_OK")
</pallas_src>

<mosaic_0001>
module attributes {stable_mosaic.version = 11 : i64} {
  func.func @_corners_loss_kernel(%arg0: i32, %arg1: memref<7x1x128xf32, #tpu.memory_space<vmem>>, %arg2: memref<3x1x128xf32, #tpu.memory_space<vmem>>) attributes {dimension_semantics = [#tpu.dimension_semantics<parallel>], iteration_bounds = array<i64: 1>, scalar_prefetch = 0 : i64, scratch_operands = 0 : i64, tpu.core_type = #tpu.core_type<tc>, window_params = [{transform_indices = @transform_0, window_bounds = array<i64: 7, 1, 128>}, {transform_indices = @transform_1, window_bounds = array<i64: 3, 1, 128>}]} {
    %c0 = arith.constant 0 : index
    %c0_0 = arith.constant 0 : index
    %c0_1 = arith.constant 0 : index
    %0 = vector.load %arg1[%c0, %c0_0, %c0_1] : memref<7x1x128xf32, #tpu.memory_space<vmem>>, vector<1x1x128xf32>
    %1 = vector.shape_cast %0 : vector<1x1x128xf32> to vector<1x128xf32>
    %c1 = arith.constant 1 : index
    %c0_2 = arith.constant 0 : index
    %c0_3 = arith.constant 0 : index
    %2 = vector.load %arg1[%c1, %c0_2, %c0_3] : memref<7x1x128xf32, #tpu.memory_space<vmem>>, vector<1x1x128xf32>
    %3 = vector.shape_cast %2 : vector<1x1x128xf32> to vector<1x128xf32>
    %c2 = arith.constant 2 : index
    %c0_4 = arith.constant 0 : index
    %c0_5 = arith.constant 0 : index
    %4 = vector.load %arg1[%c2, %c0_4, %c0_5] : memref<7x1x128xf32, #tpu.memory_space<vmem>>, vector<1x1x128xf32>
    %5 = vector.shape_cast %4 : vector<1x1x128xf32> to vector<1x128xf32>
    %c3 = arith.constant 3 : index
    %c0_6 = arith.constant 0 : index
    %c0_7 = arith.constant 0 : index
    %6 = vector.load %arg1[%c3, %c0_6, %c0_7] : memref<7x1x128xf32, #tpu.memory_space<vmem>>, vector<1x1x128xf32>
    %7 = vector.shape_cast %6 : vector<1x1x128xf32> to vector<1x128xf32>
    %c4 = arith.constant 4 : index
    %c0_8 = arith.constant 0 : index
    %c0_9 = arith.constant 0 : index
    %8 = vector.load %arg1[%c4, %c0_8, %c0_9] : memref<7x1x128xf32, #tpu.memory_space<vmem>>, vector<1x1x128xf32>
    %9 = vector.shape_cast %8 : vector<1x1x128xf32> to vector<1x128xf32>
    %c5 = arith.constant 5 : index
    %c0_10 = arith.constant 0 : index
    %c0_11 = arith.constant 0 : index
    %10 = vector.load %arg1[%c5, %c0_10, %c0_11] : memref<7x1x128xf32, #tpu.memory_space<vmem>>, vector<1x1x128xf32>
    %11 = vector.shape_cast %10 : vector<1x1x128xf32> to vector<1x128xf32>
    %c6 = arith.constant 6 : index
    %c0_12 = arith.constant 0 : index
    %c0_13 = arith.constant 0 : index
    %12 = vector.load %arg1[%c6, %c0_12, %c0_13] : memref<7x1x128xf32, #tpu.memory_space<vmem>>, vector<1x1x128xf32>
    %13 = vector.shape_cast %12 : vector<1x1x128xf32> to vector<1x128xf32>
    %14 = arith.subf %5, %7 : vector<1x128xf32>
    %15 = math.absf %14 : vector<1x128xf32>
    %16 = arith.maximumf %5, %7 : vector<1x128xf32>
    %cst = arith.constant 0.000000e+00 : f32
    %17 = vector.broadcast %cst : f32 to vector<1x128xf32>
    %18 = arith.subf %17, %15 : vector<1x128xf32>
    %19 = math.exp %18 : vector<1x128xf32>
    %cst_14 = arith.constant 1.000000e+00 : f32
    %20 = vector.broadcast %cst_14 : f32 to vector<1x128xf32>
    %21 = arith.addf %20, %19 : vector<1x128xf32>
    %22 = math.log %21 : vector<1x128xf32>
    %23 = arith.addf %16, %22 : vector<1x128xf32>
    %cst_15 = arith.constant 0.000000e+00 : f32
    %24 = vector.broadcast %cst_15 : f32 to vector<1x128xf32>
    %25 = arith.cmpf ogt, %13, %24 : vector<1x128xf32>
    %26 = arith.select %25, %7, %5 : vector<1x128xi1>, vector<1x128xf32>
    %27 = arith.subf %23, %26 : vector<1x128xf32>
    %c0_16 = arith.constant 0 : index
    %c0_17 = arith.constant 0 : index
    %c0_18 = arith.constant 0 : index
    %28 = vector.load %arg2[%c0_16, %c0_17, %c0_18] : memref<3x1x128xf32, #tpu.memory_space<vmem>>, vector<1x1x128xf32>
    %29 = vector.shape_cast %28 : vector<1x1x128xf32> to vector<1x128xf32>
    %30 = vector.shape_cast %27 : vector<1x128xf32> to vector<1x1x128xf32>
    tpu.vector_store %arg2[%c0_16, %c0_17, %c0_18], %30 {strides = array<i32>} : memref<3x1x128xf32, #tpu.memory_space<vmem>>, vector<1x1x128xf32>,
    %31 = arith.subf %1, %9 : vector<1x128xf32>
    %32 = arith.subf %3, %11 : vector<1x128xf32>
    %33 = arith.mulf %31, %31 : vector<1x128xf32>
    %34 = arith.mulf %32, %32 : vector<1x128xf32>
    %35 = arith.mulf %33, %13 : vector<1x128xf32>
    %36 = arith.mulf %34, %13 : vector<1x128xf32>
    %c1_19 = arith.constant 1 : index
    %c0_20 = arith.constant 0 : index
    %c0_21 = arith.constant 0 : index
    %37 = vector.load %arg2[%c1_19, %c0_20, %c0_21] : memref<3x1x128xf32, #tpu.memory_space<vmem>>, vector<1x1x128xf32>
    %38 = vector.shape_cast %37 : vector<1x1x128xf32> to vector<1x128xf32>
    %39 = vector.shape_cast %35 : vector<1x128xf32> to vector<1x1x128xf32>
    tpu.vector_store %arg2[%c1_19, %c0_20, %c0_21], %39 {strides = array<i32>} : memref<3x1x128xf32, #tpu.memory_space<vmem>>, vector<1x1x128xf32>,
    %c2_22 = arith.constant 2 : index
    %c0_23 = arith.constant 0 : index
    %c0_24 = arith.constant 0 : index
    %40 = vector.load %arg2[%c2_22, %c0_23, %c0_24] : memref<3x1x128xf32, #tpu.memory_space<vmem>>, vector<1x1x128xf32>
    %41 = vector.shape_cast %40 : vector<1x1x128xf32> to vector<1x128xf32>
    %42 = vector.shape_cast %36 : vector<1x128xf32> to vector<1x1x128xf32>
    tpu.vector_store %arg2[%c2_22, %c0_23, %c0_24], %42 {strides = array<i32>} : memref<3x1x128xf32, #tpu.memory_space<vmem>>, vector<1x1x128xf32>,
    return
  }
  func.func @transform_0(%arg0: i32) -> (i32, i32, i32) {
    %c0_i32 = arith.constant 0 : i32
    %c0_i32_0 = arith.constant 0 : i32
    %c0_i32_1 = arith.constant 0 : i32
    return %c0_i32, %arg0, %c0_i32_0 : i32, i32, i32
  }
  func.func @transform_1(%arg0: i32) -> (i32, i32, i32) {
    %c0_i32 = arith.constant 0 : i32
    %c0_i32_0 = arith.constant 0 : i32
    %c0_i32_1 = arith.constant 0 : i32
    return %c0_i32, %arg0, %c0_i32_0 : i32, i32, i32
  }
}

</mosaic_0001>

<bundles_post_ra>
// kernel: tpu_custom_call.1
= control target key start
LH: loop header
LB: loop body
LE: loop exit
PB: predicated region body
PF: predicated region fallthrough
CT: control target
= control target key end

     0   :  { %6 = vsyncpa [#allocation3], 0  ;;  %s167_s0 = inlined_call_operand.hbm [shape: f32[7,1,128], index: 0, kind: input, shape index: {}]   ;;  %s168_s1 = inlined_call_operand.hbm [shape: f32[3,1,128], index: 1, kind: output, shape index: {}]  }
   0x1   :  { %7 = vsyncpa [#allocation4], 0  ;;  %s12_s8 = sshll.u32 %s167_s0, 4  ;;  %s141_s9 = smov [#allocation2]   ;;  %s13_s8 = int_to_ptr.hbm [resolvable:$true] %s12_s8 }
   0x2   :  { %s14_s10 = sshll.u32 %s141_s9, 4  ;;  %s142_s11 = smov 16   ;;  %s15_s10 = int_to_ptr.vmem [resolvable:$true] %s14_s10 }
   0x3   :  { %s143_s12 = smov 1  }
   0x4   :  { %20 = dma.hbm_to_vmem [thread:$0]  %s13_s8, 112, %s15_s10, [#allocation3], %s142_s11, %s142_s11, %s143_s12  }
   0x5   :  { %137 = dma.done.wait [#allocation3], 112  }
   0x6   :  { %138 = vsyncadd [#allocation3], 4294967184  ;;  %v29_v0 = vld [vmem:[#allocation2 + $0x2] sm:$0x1]  ;;  %v31_v1 = vld [vmem:[#allocation2 + $0x3] sm:$0x1] }
   0x7   :  { %v38_v2 = vsub.f32 %v29_v0, %v31_v1  ;;  %v25_v3 = vld [vmem:[#allocation2] sm:$0x1]  ;;  %v33_v4 = vld [vmem:[#allocation2 + $0x4] sm:$0x1]  ;;  %v27_v6 = vld [vmem:[#allocation2 + $0x1] sm:$0x1]  ;;  %v40_v19 = vmax.f32 %v29_v0, %v31_v1 }
   0x8   :  { %v52_v5 = vsub.f32 %v25_v3, %v33_v4  ;;  %v35_v7 = vld [vmem:[#allocation2 + $0x5] sm:$0x1]  ;;  %v37_v11 = vld [vmem:[#allocation2 + $0x6] sm:$0x1]  ;;  %s144_s0 = smov [#allocation5]   ;;  %s68_s16 = sshll.u32 %s168_s1, 4  ;;  %s69_s16 = int_to_ptr.hbm [resolvable:$true] %s68_s16 }
   0x9   :  { %v39_v8 = vand.u32 2147483647, %v38_v2  ;;  %v53_v9 = vsub.f32 %v27_v6, %v35_v7  ;;  %vm48_vm0 = vcmp.gt.f32.partialorder %v37_v11, 0.0  ;;  %s66_s13 = sshll.u32 %s144_s0, 4  ;;  %s67_s13 = int_to_ptr.vmem [resolvable:$true] %s66_s13 }
   0xa   :  { %v54_v10 = vmul.f32 %v52_v5, %v52_v5  ;;  %v49_v22 = vsel %vm48_vm0, %v31_v1, %v29_v0 }
   0xb   :  { %v41_v12 = vsub.f32 0.0, %v39_v8  ;;  %v55_v13 = vmul.f32 %v53_v9, %v53_v9 }
   0xc   :  { %v56_v14 = vmul.f32 %v54_v10, %v37_v11 }
   0xd   :  { %v42_v15 = vmul.f32 1.442695, %v41_v12  ;;  %v57_v16 = vmul.f32 %v55_v13, %v37_v11 }
   0xe   :  { %59 = vst [vmem:[#allocation5 + $0x1] sm:$0x1] %v56_v14 }
   0xf   :  { %85 = vpow2.f32 %v42_v15  ;;  %61 = vst [vmem:[#allocation5 + $0x2] sm:$0x1] %v57_v16 }
  0x15   :  { %v86_v17 = vpop.eup %85 }
  0x16   :  { %v44_v18 = vadd.f32 1.0, %v86_v17 }
  0x18   :  { %87 = vlog2.f32 %v44_v18 }
  0x1e   :  { %v88_v20 = vpop.eup %87 }
  0x1f   :  { %v46_v21 = vmul.f32 0.6931472, %v88_v20 }
  0x21   :  { %v47_v23 = vadd.f32 %v46_v21, %v40_v19 }
  0x23   :  { %v50_v24 = vsub.f32 %v47_v23, %v49_v22 }
  0x25   :  { %51 = vst [vmem:[#allocation5] sm:$0x1] %v50_v24 }
  0x26   :  { %74 = dma.vmem_to_hbm [thread:$0]  %s67_s13, 48, %s69_s16, [#allocation4], %s142_s11, %s142_s11, %s143_s12  }
  0x27   :  { %139 = dma.done.wait [#allocation4], 48  }
  0x28   :  { %140 = vsyncadd [#allocation4], 4294967248 }
  0x29   :  { %79 = vsyncpa [#allocation3], 1 }
  0x2a   :  { %80 = vsyncpa [#allocation4], 1 }

</bundles_post_ra>
